<compile_context>
chip_gen: v7x
topology: tpu7x:2x2x1
jax: 0.10.0
libtpu: 0.0.40
codegen_flags: <defaults>
</compile_context>

<pallas_src>
import functools
import math

import jax
import jax.numpy as jnp
from jax import lax
from jax.experimental import pallas as pl
from jax.experimental.pallas import tpu as pltpu


def _device_kind():
    try:
        return jax.devices()[0].device_kind.lower()
    except Exception:  # pragma: no cover - defensive, e.g. during AOT tracing
        return ""


_KIND = _device_kind()
_IS_V5 = "v5" in _KIND
# v6e: 128 MiB physical -> allow 64 MiB scoped.  v7x: only 64 MiB physical per
# TC -> keep headroom.  v5e / unknown: keep 32 MiB (default scoped is 16 MiB).
if "v6" in _KIND:
    _VMEM_LIMIT = 64 * 1024 * 1024
elif "v7" in _KIND:
    _VMEM_LIMIT = 48 * 1024 * 1024
else:
    _VMEM_LIMIT = 32 * 1024 * 1024


def _pick_tile(dim, cap, align):
    """Largest tile <= cap that divides `dim` and is a multiple of `align`.
    Falls back to the full dim (always a legal block size)."""
    if dim <= cap:
        return dim
    t = (cap // align) * align
    while t >= align:
        if dim % t == 0:
            return t
        t -= align
    return dim


# -----------------------------------------------------------------------------
# Kernel A: fused Q|K|V linear projection (tiled, pipelined, bf16 MXU, f32 acc).
# -----------------------------------------------------------------------------
def qkv_proj_kernel(x_ref, w_ref, b_ref, o_ref, acc_ref):
    k_idx = pl.program_id(2)

    @pl.when(k_idx == 0)
    def _init():
        acc_ref[...] = jnp.zeros_like(acc_ref)

    acc_ref[...] += jnp.dot(x_ref[...], w_ref[...],
                            preferred_element_type=jnp.float32)

    @pl.when(k_idx == pl.num_programs(2) - 1)
    def _store():
        o_ref[...] = (acc_ref[...] + b_ref[...]).astype(o_ref.dtype)


def qkv_projection(x2d_bf16, w_qkv, b_qkv):
    M, K = x2d_bf16.shape
    N3 = w_qkv.shape[1]                      # 3 * attention_dim
    tm = _pick_tile(M, 512, 16)              # bf16 packs 16 rows per vreg
    tn = _pick_tile(N3, 512, 128)
    tk = _pick_tile(K, 512, 128)
    grid = (M // tm, N3 // tn, K // tk)

    x_spec = pl.BlockSpec((tm, tk), lambda i, j, k: (i, k))
    w_spec = pl.BlockSpec((tk, tn), lambda i, j, k: (k, j))
    b_spec = pl.BlockSpec((1, tn), lambda i, j, k: (0, j))
    o_spec = pl.BlockSpec((tm, tn), lambda i, j, k: (i, j))

    cost = pl.CostEstimate(
        flops=int(2 * M * K * N3),
        transcendentals=0,
        bytes_accessed=int(M * K * 2 + K * N3 * 2 + M * N3 * 2 + N3 * 4),
    )
    return pl.pallas_call(
        qkv_proj_kernel,
        out_shape=jax.ShapeDtypeStruct((M, N3), jnp.bfloat16),
        grid=grid,
        in_specs=[x_spec, w_spec, b_spec],
        out_specs=o_spec,
        scratch_shapes=[pltpu.VMEM((tm, tn), jnp.float32)],
        compiler_params=pltpu.CompilerParams(
            dimension_semantics=("parallel", "parallel", "arbitrary"),
            vmem_limit_bytes=_VMEM_LIMIT,
        ),
        cost_estimate=cost,
    )(x2d_bf16, w_qkv, b_qkv)


# -----------------------------------------------------------------------------
# Kernel B: attention.  One query tile x all heads per grid step; the fused
# (S, 3A) Q|K|V block stays VMEM-resident across the query tiles of a batch;
# output written lane-dense (single full-width store) to (B, S, A) bf16.
# -----------------------------------------------------------------------------
def attn_kernel(q_ref, kv_ref, mask_ref, o_ref, *,
                num_heads, head_size, attn_dim, use_bf16_exp):
    tq = q_ref.shape[0]
    S = kv_ref.shape[0]
    exp_dtype = jnp.bfloat16 if use_bf16_exp else jnp.float32

    # Hoist the (1, S) -> (tq, S) mask broadcast out of the head loop
    # (JAX does not CSE broadcast_in_dim).
    mask = jnp.broadcast_to(mask_ref[...].astype(jnp.float32), (tq, S))

    ctx_parts = []
    for h in range(num_heads):                               # static unroll
        q_lo = h * head_size
        k_lo = attn_dim + h * head_size
        v_lo = 2 * attn_dim + h * head_size
        qh = q_ref[:, q_lo:q_lo + head_size]                 # (tq, Dh) bf16, scale pre-folded
        kh = kv_ref[:, k_lo:k_lo + head_size]                # (S,  Dh) bf16
        vh = kv_ref[:, v_lo:v_lo + head_size]                # (S,  Dh) bf16

        # scores = qh @ kh^T without materializing a JAX-level transpose.
        s = lax.dot_general(qh, kh, (((1,), (1,)), ((), ())),
                            preferred_element_type=jnp.float32)   # (tq, S)
        s = s + mask
        m = jnp.max(s, axis=-1, keepdims=True)
        e = jnp.exp((s - m).astype(exp_dtype))               # bf16 EUP on v6e/v7x
        l = jnp.sum(e.astype(jnp.float32), axis=-1, keepdims=True)

        # Deferred softmax normalization: PV matmul first, then one cheap
        # (tq, 1) reciprocal on the EUP.
        ctx = jnp.dot(e.astype(vh.dtype), vh,
                      preferred_element_type=jnp.float32)          # (tq, Dh)
        ctx = ctx * pl.reciprocal(l, approx=True)
        ctx_parts.append(ctx.astype(o_ref.dtype))

    # Single lane-dense (tq, A) store instead of per-head 64-lane masked stores.
    o_ref[...] = jnp.concatenate(ctx_parts, axis=-1)


def attention(qkv3, mask, *, num_heads, head_size, attention_dim):
    B, S, N3 = qkv3.shape
    A = attention_dim
    tq = _pick_tile(S, 256, 16)
    grid = (B, S // tq)

    # Narrow the per-tile query block to just the Q columns when that is a
    # legal lane-blocking (A multiple of 128); otherwise stream the full width.
    if A % 128 == 0:
        q_spec = pl.BlockSpec((None, tq, A), lambda b, qi: (b, qi, 0))
    else:
        q_spec = pl.BlockSpec((None, tq, N3), lambda b, qi: (b, qi, 0))
    kv_spec = pl.BlockSpec((None, S, N3), lambda b, qi: (b, 0, 0))   # resident across qi
    mask_spec = pl.BlockSpec((None, None, 1, S), lambda b, qi: (b, 0, 0, 0))
    o_spec = pl.BlockSpec((None, tq, A), lambda b, qi: (b, qi, 0))

    cost = pl.CostEstimate(
        flops=int(4 * B * S * S * num_heads * head_size),
        transcendentals=int(B * num_heads * S * S),
        bytes_accessed=int(2 * B * S * N3 * 2 + B * S * A * 2 + B * S * 4),
    )
    return pl.pallas_call(
        functools.partial(attn_kernel, num_heads=num_heads, head_size=head_size,
                          attn_dim=A, use_bf16_exp=not _IS_V5),
        out_shape=jax.ShapeDtypeStruct((B, S, A), jnp.bfloat16),
        grid=grid,
        in_specs=[q_spec, kv_spec, mask_spec],
        out_specs=o_spec,
        compiler_params=pltpu.CompilerParams(
            dimension_semantics=("parallel", "arbitrary"),
            vmem_limit_bytes=_VMEM_LIMIT,
        ),
        cost_estimate=cost,
    )(qkv3, qkv3, mask)


# -----------------------------------------------------------------------------
# Parameter prep (done ONCE, outside the per-call forward) + full forward pass.
# -----------------------------------------------------------------------------
def prepare_params(params, attention_head_size):
    """Fuse Q|K|V weights into a single (hidden, 3*A) bf16 matrix and a single
    (1, 3*A) f32 bias, folding the 1/sqrt(head_size) attention scale into the
    query projection (mathematically identical to scaling the scores)."""
    scale = 1.0 / math.sqrt(attention_head_size)
    w_fused = jnp.concatenate(
        [params["wq"].T * scale, params["wk"].T, params["wv"].T], axis=1)
    b_fused = jnp.concatenate(
        [params["bq"] * scale, params["bk"], params["bv"]], axis=0)
    return {
        "w_qkv": w_fused.astype(jnp.bfloat16),                  # (hidden, 3A)
        "b_qkv": b_fused.reshape(1, -1).astype(jnp.float32),    # (1, 3A)
    }


@functools.partial(jax.jit,
                   static_argnames=("num_heads", "head_size", "attention_dim"))
def standard_bert_self_attention(hidden_states, prepared, attention_mask, *,
                                 num_heads, head_size, attention_dim):
    B, S, Hd = hidden_states.shape
    # Pre-cast activations once (bf16 MXU feed, halves x HBM traffic).
    x2d = hidden_states.reshape(B * S, Hd).astype(jnp.bfloat16)

    qkv2d = qkv_projection(x2d, prepared["w_qkv"], prepared["b_qkv"])  # (B*S, 3A)
    # Free row-major reshape; Q/K/V are never sliced or transposed in HBM.
    qkv3 = qkv2d.reshape(B, S, 3 * attention_dim)

    if attention_mask is None:
        attention_mask = jnp.zeros((B, 1, 1, S), dtype=jnp.float32)
    else:
        attention_mask = attention_mask.astype(jnp.float32)

    return attention(qkv3, attention_mask, num_heads=num_heads,
                     head_size=head_size, attention_dim=attention_dim)


# -----------------------------------------------------------------------------
# Pure-JAX f32 reference (mirrors the PyTorch forward) for validation.
# -----------------------------------------------------------------------------
def reference_forward(hidden_states, params, attention_mask, *, H, Dh, attn_dim):
    B, S, _ = hidden_states.shape
    q = hidden_states @ params["wq"].T + params["bq"]
    k = hidden_states @ params["wk"].T + params["bk"]
    v = hidden_states @ params["wv"].T + params["bv"]

    def split(x):
        return jnp.transpose(x.reshape(B, S, H, Dh), (0, 2, 1, 3))

    q, k, v = split(q), split(k), split(v)
    scores = jnp.einsum("bhqd,bhkd->bhqk", q, k) / (Dh ** 0.5)
    if attention_mask is not None:
        scores = scores + attention_mask
    probs = jax.nn.softmax(scores, axis=-1)
    ctx = jnp.einsum("bhqk,bhkd->bhqd", probs, v)
    ctx = jnp.transpose(ctx, (0, 2, 1, 3)).reshape(B, S, attn_dim)
    return ctx


if __name__ == "__main__":
    # Small, self-consistent config:
    #   hidden_size=32, config num_attention_heads=4 -> head_size=8
    #   attention_dim=32 -> module uses 32 // 8 = 4 heads, all_head_size=32
    B, S = 2, 8
    hidden_size = 32
    config_num_heads = 4
    attention_dim = 32
    head_size = hidden_size // config_num_heads                 # 8
    num_heads = attention_dim // head_size                      # 4

    key = jax.random.PRNGKey(0)
    k_x, k_wq, k_wk, k_wv, k_bq, k_bk, k_bv = jax.random.split(key, 7)

    hidden_states = jax.random.normal(k_x, (B, S, hidden_size), dtype=jnp.float32)

    # nn.Linear(hidden_size, attention_dim): weight (attention_dim, hidden_size)
    params = {
        "wq": jax.random.normal(k_wq, (attention_dim, hidden_size), jnp.float32) * 0.05,
        "wk": jax.random.normal(k_wk, (attention_dim, hidden_size), jnp.float32) * 0.05,
        "wv": jax.random.normal(k_wv, (attention_dim, hidden_size), jnp.float32) * 0.05,
        "bq": jax.random.normal(k_bq, (attention_dim,), jnp.float32) * 0.01,
        "bk": jax.random.normal(k_bk, (attention_dim,), jnp.float32) * 0.01,
        "bv": jax.random.normal(k_bv, (attention_dim,), jnp.float32) * 0.01,
    }

    # BERT-style additive mask (B, 1, 1, S): mask out the last key of batch 1.
    attention_mask = jnp.zeros((B, 1, 1, S), dtype=jnp.float32)
    attention_mask = attention_mask.at[1, 0, 0, S - 1].set(-10000.0)

    prepared = prepare_params(params, head_size)   # hoisted one-time param prep

    out = standard_bert_self_attention(
        hidden_states, prepared, attention_mask,
        num_heads=num_heads, head_size=head_size, attention_dim=attention_dim,
    )
    out = jax.block_until_ready(out)

    ref = reference_forward(
        hidden_states, params, attention_mask,
        H=num_heads, Dh=head_size, attn_dim=attention_dim,
    )

    assert out.shape == (B, S, attention_dim)
    err = float(jnp.max(jnp.abs(out.astype(jnp.float32) - ref)))
    # bf16 MXU inputs/output + bf16 exp + approx reciprocal => ~1e-3-level error.
    assert err < 2e-2, f"mismatch vs reference: max abs err {err}"

    print("KERNEL_OK")
</pallas_src>

<mosaic_0001>
module attributes {stable_mosaic.version = 11 : i64} {
  func.func @qkv_proj_kernel(%arg0: i32, %arg1: i32, %arg2: i32, %arg3: memref<16x32xbf16, #tpu.memory_space<vmem>>, %arg4: memref<32x96xbf16, #tpu.memory_space<vmem>>, %arg5: memref<1x96xf32, #tpu.memory_space<vmem>>, %arg6: memref<16x96xbf16, #tpu.memory_space<vmem>>, %arg7: memref<16x96xf32, #tpu.memory_space<vmem>>) attributes {dimension_semantics = [#tpu.dimension_semantics<parallel>, #tpu.dimension_semantics<parallel>, #tpu.dimension_semantics<arbitrary>], iteration_bounds = array<i64: 1, 1, 1>, scalar_prefetch = 0 : i64, scratch_operands = 1 : i64, tpu.core_type = #tpu.core_type<tc>, window_params = [{transform_indices = @transform_0, window_bounds = array<i64: 16, 32>}, {transform_indices = @transform_1, window_bounds = array<i64: 32, 96>}, {transform_indices = @transform_2, window_bounds = array<i64: 1, 96>}, {transform_indices = @transform_3, window_bounds = array<i64: 16, 96>}]} {
    %c0_i32 = arith.constant 0 : i32
    %0 = arith.cmpi eq, %arg2, %c0_i32 : i32
    %1 = arith.extui %0 : i1 to i32
    %c0_i32_0 = arith.constant 0 : i32
    %2 = arith.cmpi ne, %1, %c0_i32_0 : i32
    scf.if %2 {
      %cst_10 = arith.constant 0.000000e+00 : f32
      %12 = vector.broadcast %cst_10 : f32 to vector<16x96xf32>
      %c0_11 = arith.constant 0 : index
      %c0_12 = arith.constant 0 : index
      %13 = vector.load %arg7[%c0_11, %c0_12] : memref<16x96xf32, #tpu.memory_space<vmem>>, vector<16x96xf32>
      tpu.vector_store %arg7[%c0_11, %c0_12], %12 {strides = array<i32>} : memref<16x96xf32, #tpu.memory_space<vmem>>, vector<16x96xf32>,
    } else {
    }
    %c0 = arith.constant 0 : index
    %c0_1 = arith.constant 0 : index
    %3 = vector.load %arg7[%c0, %c0_1] : memref<16x96xf32, #tpu.memory_space<vmem>>, vector<16x96xf32>
    %c0_2 = arith.constant 0 : index
    %c0_3 = arith.constant 0 : index
    %4 = vector.load %arg3[%c0_2, %c0_3] : memref<16x32xbf16, #tpu.memory_space<vmem>>, vector<16x32xbf16>
    %c0_4 = arith.constant 0 : index
    %c0_5 = arith.constant 0 : index
    %5 = vector.load %arg4[%c0_4, %c0_5] : memref<32x96xbf16, #tpu.memory_space<vmem>>, vector<32x96xbf16>
    %cst = arith.constant dense<0.000000e+00> : vector<16x96xf32>
    %6 = tpu.matmul %4, %5, %cst {dimension_numbers = #tpu.dot_dimension_numbers<[1], [0], [0], [1], [0, 0, 1, 1], [], []>} : vector<16x32xbf16>, vector<32x96xbf16>, vector<16x96xf32> -> vector<16x96xf32>
    %7 = arith.addf %3, %6 : vector<16x96xf32>
    %c0_6 = arith.constant 0 : index
    %c0_7 = arith.constant 0 : index
    %8 = vector.load %arg7[%c0_6, %c0_7] : memref<16x96xf32, #tpu.memory_space<vmem>>, vector<16x96xf32>
    tpu.vector_store %arg7[%c0_6, %c0_7], %7 {strides = array<i32>} : memref<16x96xf32, #tpu.memory_space<vmem>>, vector<16x96xf32>,
    %c0_i32_8 = arith.constant 0 : i32
    %9 = arith.cmpi eq, %arg2, %c0_i32_8 : i32
    %10 = arith.extui %9 : i1 to i32
    %c0_i32_9 = arith.constant 0 : i32
    %11 = arith.cmpi ne, %10, %c0_i32_9 : i32
    scf.if %11 {
      %c0_10 = arith.constant 0 : index
      %c0_11 = arith.constant 0 : index
      %12 = vector.load %arg7[%c0_10, %c0_11] : memref<16x96xf32, #tpu.memory_space<vmem>>, vector<16x96xf32>
      %c0_12 = arith.constant 0 : index
      %c0_13 = arith.constant 0 : index
      %13 = vector.load %arg5[%c0_12, %c0_13] : memref<1x96xf32, #tpu.memory_space<vmem>>, vector<1x96xf32>
      %14 = vector.broadcast %13 : vector<1x96xf32> to vector<16x96xf32>
      %15 = arith.addf %12, %14 : vector<16x96xf32>
      %16 = arith.truncf %15 : vector<16x96xf32> to vector<16x96xbf16>
      %c0_14 = arith.constant 0 : index
      %c0_15 = arith.constant 0 : index
      %17 = vector.load %arg6[%c0_14, %c0_15] : memref<16x96xbf16, #tpu.memory_space<vmem>>, vector<16x96xbf16>
      tpu.vector_store %arg6[%c0_14, %c0_15], %16 {strides = array<i32>} : memref<16x96xbf16, #tpu.memory_space<vmem>>, vector<16x96xbf16>,
    } else {
    }
    return
  }
  func.func @transform_0(%arg0: i32, %arg1: i32, %arg2: i32) -> (i32, i32) {
    %c0_i32 = arith.constant 0 : i32
    return %arg0, %arg2 : i32, i32
  }
  func.func @transform_1(%arg0: i32, %arg1: i32, %arg2: i32) -> (i32, i32) {
    %c0_i32 = arith.constant 0 : i32
    return %arg2, %arg1 : i32, i32
  }
  func.func @transform_2(%arg0: i32, %arg1: i32, %arg2: i32) -> (i32, i32) {
    %c0_i32 = arith.constant 0 : i32
    %c0_i32_0 = arith.constant 0 : i32
    return %c0_i32, %arg1 : i32, i32
  }
  func.func @transform_3(%arg0: i32, %arg1: i32, %arg2: i32) -> (i32, i32) {
    %c0_i32 = arith.constant 0 : i32
    return %arg0, %arg1 : i32, i32
  }
}

module attributes {stable_mosaic.version = 11 : i64} {
  func.func @attn_kernel(%arg0: i32, %arg1: i32, %arg2: memref<1x8x96xbf16, #tpu.memory_space<vmem>>, %arg3: memref<1x8x96xbf16, #tpu.memory_space<vmem>>, %arg4: memref<1x1x1x8xf32, #tpu.memory_space<vmem>>, %arg5: memref<1x8x32xbf16, #tpu.memory_space<vmem>>) attributes {dimension_semantics = [#tpu.dimension_semantics<parallel>, #tpu.dimension_semantics<arbitrary>], iteration_bounds = array<i64: 2, 1>, scalar_prefetch = 0 : i64, scratch_operands = 0 : i64, tpu.core_type = #tpu.core_type<tc>, window_params = [{transform_indices = @transform_0, window_bounds = array<i64: 1, 8, 96>}, {transform_indices = @transform_1, window_bounds = array<i64: 1, 8, 96>}, {transform_indices = @transform_2, window_bounds = array<i64: 1, 1, 1, 8>}, {transform_indices = @transform_3, window_bounds = array<i64: 1, 8, 32>}]} {
    %c0 = arith.constant 0 : index
    %c0_0 = arith.constant 0 : index
    %c0_1 = arith.constant 0 : index
    %c0_2 = arith.constant 0 : index
    %0 = vector.load %arg4[%c0, %c0_0, %c0_1, %c0_2] : memref<1x1x1x8xf32, #tpu.memory_space<vmem>>, vector<1x1x1x8xf32>
    %1 = vector.shape_cast %0 : vector<1x1x1x8xf32> to vector<1x8xf32>
    %2 = vector.shape_cast %1 : vector<1x8xf32> to vector<1x8xf32>
    %3 = vector.broadcast %2 : vector<1x8xf32> to vector<8x8xf32>
    %c0_3 = arith.constant 0 : index
    %c0_4 = arith.constant 0 : index
    %c0_5 = arith.constant 0 : index
    %4 = vector.load %arg2[%c0_3, %c0_4, %c0_5] : memref<1x8x96xbf16, #tpu.memory_space<vmem>>, vector<1x8x8xbf16>
    %5 = vector.shape_cast %4 : vector<1x8x8xbf16> to vector<8x8xbf16>
    %c0_6 = arith.constant 0 : index
    %c0_7 = arith.constant 0 : index
    %c32 = arith.constant 32 : index
    %6 = vector.load %arg3[%c0_6, %c0_7, %c32] : memref<1x8x96xbf16, #tpu.memory_space<vmem>>, vector<1x8x8xbf16>
    %7 = vector.shape_cast %6 : vector<1x8x8xbf16> to vector<8x8xbf16>
    %c0_8 = arith.constant 0 : index
    %c0_9 = arith.constant 0 : index
    %c64 = arith.constant 64 : index
    %8 = vector.load %arg3[%c0_8, %c0_9, %c64] : memref<1x8x96xbf16, #tpu.memory_space<vmem>>, vector<1x8x8xbf16>
    %9 = vector.shape_cast %8 : vector<1x8x8xbf16> to vector<8x8xbf16>
    %cst = arith.constant dense<0.000000e+00> : vector<8x8xf32>
    %10 = tpu.matmul %5, %7, %cst {dimension_numbers = #tpu.dot_dimension_numbers<[1], [1], [0], [0], [0, 0, 1, 0], [], []>} : vector<8x8xbf16>, vector<8x8xbf16>, vector<8x8xf32> -> vector<8x8xf32>
    %11 = arith.addf %10, %3 : vector<8x8xf32>
    %cst_10 = arith.constant dense<0xFF800000> : vector<8xf32>
    %12 = vector.multi_reduction <maximumf>, %11, %cst_10 [1] : vector<8x8xf32> to vector<8xf32>
    %13 = vector.shape_cast %12 : vector<8xf32> to vector<8x1xf32>
    %14 = vector.broadcast %13 : vector<8x1xf32> to vector<8x8xf32>
    %15 = arith.subf %11, %14 : vector<8x8xf32>
    %16 = arith.truncf %15 : vector<8x8xf32> to vector<8x8xbf16>
    %17 = math.exp %16 : vector<8x8xbf16>
    %18 = arith.extf %17 : vector<8x8xbf16> to vector<8x8xf32>
    %cst_11 = arith.constant dense<0.000000e+00> : vector<8xf32>
    %19 = vector.multi_reduction <add>, %18, %cst_11 [1] : vector<8x8xf32> to vector<8xf32>
    %20 = vector.shape_cast %19 : vector<8xf32> to vector<8x1xf32>
    %cst_12 = arith.constant dense<0.000000e+00> : vector<8x8xf32>
    %21 = tpu.matmul %17, %9, %cst_12 {dimension_numbers = #tpu.dot_dimension_numbers<[1], [0], [0], [1], [0, 0, 1, 1], [], []>} : vector<8x8xbf16>, vector<8x8xbf16>, vector<8x8xf32> -> vector<8x8xf32>
    %22 = tpu.reciprocal %20 {approx = true} : vector<8x1xf32> -> vector<8x1xf32>
    %23 = vector.broadcast %22 : vector<8x1xf32> to vector<8x8xf32>
    %24 = arith.mulf %21, %23 : vector<8x8xf32>
    %25 = arith.truncf %24 : vector<8x8xf32> to vector<8x8xbf16>
    %c0_13 = arith.constant 0 : index
    %c0_14 = arith.constant 0 : index
    %c8 = arith.constant 8 : index
    %26 = vector.load %arg2[%c0_13, %c0_14, %c8] : memref<1x8x96xbf16, #tpu.memory_space<vmem>>, vector<1x8x8xbf16>
    %27 = vector.shape_cast %26 : vector<1x8x8xbf16> to vector<8x8xbf16>
    %c0_15 = arith.constant 0 : index
    %c0_16 = arith.constant 0 : index
    %c40 = arith.constant 40 : index
    %28 = vector.load %arg3[%c0_15, %c0_16, %c40] : memref<1x8x96xbf16, #tpu.memory_space<vmem>>, vector<1x8x8xbf16>
    %29 = vector.shape_cast %28 : vector<1x8x8xbf16> to vector<8x8xbf16>
    %c0_17 = arith.constant 0 : index
    %c0_18 = arith.constant 0 : index
    %c72 = arith.constant 72 : index
    %30 = vector.load %arg3[%c0_17, %c0_18, %c72] : memref<1x8x96xbf16, #tpu.memory_space<vmem>>, vector<1x8x8xbf16>
    %31 = vector.shape_cast %30 : vector<1x8x8xbf16> to vector<8x8xbf16>
    %cst_19 = arith.constant dense<0.000000e+00> : vector<8x8xf32>
    %32 = tpu.matmul %27, %29, %cst_19 {dimension_numbers = #tpu.dot_dimension_numbers<[1], [1], [0], [0], [0, 0, 1, 0], [], []>} : vector<8x8xbf16>, vector<8x8xbf16>, vector<8x8xf32> -> vector<8x8xf32>
    %33 = arith.addf %32, %3 : vector<8x8xf32>
    %cst_20 = arith.constant dense<0xFF800000> : vector<8xf32>
    %34 = vector.multi_reduction <maximumf>, %33, %cst_20 [1] : vector<8x8xf32> to vector<8xf32>
    %35 = vector.shape_cast %34 : vector<8xf32> to vector<8x1xf32>
    %36 = vector.broadcast %35 : vector<8x1xf32> to vector<8x8xf32>
    %37 = arith.subf %33, %36 : vector<8x8xf32>
    %38 = arith.truncf %37 : vector<8x8xf32> to vector<8x8xbf16>
    %39 = math.exp %38 : vector<8x8xbf16>
    %40 = arith.extf %39 : vector<8x8xbf16> to vector<8x8xf32>
    %cst_21 = arith.constant dense<0.000000e+00> : vector<8xf32>
    %41 = vector.multi_reduction <add>, %40, %cst_21 [1] : vector<8x8xf32> to vector<8xf32>
    %42 = vector.shape_cast %41 : vector<8xf32> to vector<8x1xf32>
    %cst_22 = arith.constant dense<0.000000e+00> : vector<8x8xf32>
    %43 = tpu.matmul %39, %31, %cst_22 {dimension_numbers = #tpu.dot_dimension_numbers<[1], [0], [0], [1], [0, 0, 1, 1], [], []>} : vector<8x8xbf16>, vector<8x8xbf16>, vector<8x8xf32> -> vector<8x8xf32>
    %44 = tpu.reciprocal %42 {approx = true} : vector<8x1xf32> -> vector<8x1xf32>
    %45 = vector.broadcast %44 : vector<8x1xf32> to vector<8x8xf32>
    %46 = arith.mulf %43, %45 : vector<8x8xf32>
    %47 = arith.truncf %46 : vector<8x8xf32> to vector<8x8xbf16>
    %c0_23 = arith.constant 0 : index
    %c0_24 = arith.constant 0 : index
    %c16 = arith.constant 16 : index
    %48 = vector.load %arg2[%c0_23, %c0_24, %c16] : memref<1x8x96xbf16, #tpu.memory_space<vmem>>, vector<1x8x8xbf16>
    %49 = vector.shape_cast %48 : vector<1x8x8xbf16> to vector<8x8xbf16>
    %c0_25 = arith.constant 0 : index
    %c0_26 = arith.constant 0 : index
    %c48 = arith.constant 48 : index
    %50 = vector.load %arg3[%c0_25, %c0_26, %c48] : memref<1x8x96xbf16, #tpu.memory_space<vmem>>, vector<1x8x8xbf16>
    %51 = vector.shape_cast %50 : vector<1x8x8xbf16> to vector<8x8xbf16>
    %c0_27 = arith.constant 0 : index
    %c0_28 = arith.constant 0 : index
    %c80 = arith.constant 80 : index
    %52 = vector.load %arg3[%c0_27, %c0_28, %c80] : memref<1x8x96xbf16, #tpu.memory_space<vmem>>, vector<1x8x8xbf16>
    %53 = vector.shape_cast %52 : vector<1x8x8xbf16> to vector<8x8xbf16>
    %cst_29 = arith.constant dense<0.000000e+00> : vector<8x8xf32>
    %54 = tpu.matmul %49, %51, %cst_29 {dimension_numbers = #tpu.dot_dimension_numbers<[1], [1], [0], [0], [0, 0, 1, 0], [], []>} : vector<8x8xbf16>, vector<8x8xbf16>, vector<8x8xf32> -> vector<8x8xf32>
    %55 = arith.addf %54, %3 : vector<8x8xf32>
    %cst_30 = arith.constant dense<0xFF800000> : vector<8xf32>
    %56 = vector.multi_reduction <maximumf>, %55, %cst_30 [1] : vector<8x8xf32> to vector<8xf32>
    %57 = vector.shape_cast %56 : vector<8xf32> to vector<8x1xf32>
    %58 = vector.broadcast %57 : vector<8x1xf32> to vector<8x8xf32>
    %59 = arith.subf %55, %58 : vector<8x8xf32>
    %60 = arith.truncf %59 : vector<8x8xf32> to vector<8x8xbf16>
    %61 = math.exp %60 : vector<8x8xbf16>
    %62 = arith.extf %61 : vector<8x8xbf16> to vector<8x8xf32>
    %cst_31 = arith.constant dense<0.000000e+00> : vector<8xf32>
    %63 = vector.multi_reduction <add>, %62, %cst_31 [1] : vector<8x8xf32> to vector<8xf32>
    %64 = vector.shape_cast %63 : vector<8xf32> to vector<8x1xf32>
    %cst_32 = arith.constant dense<0.000000e+00> : vector<8x8xf32>
    %65 = tpu.matmul %61, %53, %cst_32 {dimension_numbers = #tpu.dot_dimension_numbers<[1], [0], [0], [1], [0, 0, 1, 1], [], []>} : vector<8x8xbf16>, vector<8x8xbf16>, vector<8x8xf32> -> vector<8x8xf32>
    %66 = tpu.reciprocal %64 {approx = true} : vector<8x1xf32> -> vector<8x1xf32>
    %67 = vector.broadcast %66 : vector<8x1xf32> to vector<8x8xf32>
    %68 = arith.mulf %65, %67 : vector<8x8xf32>
    %69 = arith.truncf %68 : vector<8x8xf32> to vector<8x8xbf16>
    %c0_33 = arith.constant 0 : index
    %c0_34 = arith.constant 0 : index
    %c24 = arith.constant 24 : index
    %70 = vector.load %arg2[%c0_33, %c0_34, %c24] : memref<1x8x96xbf16, #tpu.memory_space<vmem>>, vector<1x8x8xbf16>
    %71 = vector.shape_cast %70 : vector<1x8x8xbf16> to vector<8x8xbf16>
    %c0_35 = arith.constant 0 : index
    %c0_36 = arith.constant 0 : index
    %c56 = arith.constant 56 : index
    %72 = vector.load %arg3[%c0_35, %c0_36, %c56] : memref<1x8x96xbf16, #tpu.memory_space<vmem>>, vector<1x8x8xbf16>
    %73 = vector.shape_cast %72 : vector<1x8x8xbf16> to vector<8x8xbf16>
    %c0_37 = arith.constant 0 : index
    %c0_38 = arith.constant 0 : index
    %c88 = arith.constant 88 : index
    %74 = vector.load %arg3[%c0_37, %c0_38, %c88] : memref<1x8x96xbf16, #tpu.memory_space<vmem>>, vector<1x8x8xbf16>
    %75 = vector.shape_cast %74 : vector<1x8x8xbf16> to vector<8x8xbf16>
    %cst_39 = arith.constant dense<0.000000e+00> : vector<8x8xf32>
    %76 = tpu.matmul %71, %73, %cst_39 {dimension_numbers = #tpu.dot_dimension_numbers<[1], [1], [0], [0], [0, 0, 1, 0], [], []>} : vector<8x8xbf16>, vector<8x8xbf16>, vector<8x8xf32> -> vector<8x8xf32>
    %77 = arith.addf %76, %3 : vector<8x8xf32>
    %cst_40 = arith.constant dense<0xFF800000> : vector<8xf32>
    %78 = vector.multi_reduction <maximumf>, %77, %cst_40 [1] : vector<8x8xf32> to vector<8xf32>
    %79 = vector.shape_cast %78 : vector<8xf32> to vector<8x1xf32>
    %80 = vector.broadcast %79 : vector<8x1xf32> to vector<8x8xf32>
    %81 = arith.subf %77, %80 : vector<8x8xf32>
    %82 = arith.truncf %81 : vector<8x8xf32> to vector<8x8xbf16>
    %83 = math.exp %82 : vector<8x8xbf16>
    %84 = arith.extf %83 : vector<8x8xbf16> to vector<8x8xf32>
    %cst_41 = arith.constant dense<0.000000e+00> : vector<8xf32>
    %85 = vector.multi_reduction <add>, %84, %cst_41 [1] : vector<8x8xf32> to vector<8xf32>
    %86 = vector.shape_cast %85 : vector<8xf32> to vector<8x1xf32>
    %cst_42 = arith.constant dense<0.000000e+00> : vector<8x8xf32>
    %87 = tpu.matmul %83, %75, %cst_42 {dimension_numbers = #tpu.dot_dimension_numbers<[1], [0], [0], [1], [0, 0, 1, 1], [], []>} : vector<8x8xbf16>, vector<8x8xbf16>, vector<8x8xf32> -> vector<8x8xf32>
    %88 = tpu.reciprocal %86 {approx = true} : vector<8x1xf32> -> vector<8x1xf32>
    %89 = vector.broadcast %88 : vector<8x1xf32> to vector<8x8xf32>
    %90 = arith.mulf %87, %89 : vector<8x8xf32>
    %91 = arith.truncf %90 : vector<8x8xf32> to vector<8x8xbf16>
    %92 = tpu.concatenate %25, %47, %69, %91 in 1 : vector<8x8xbf16>, vector<8x8xbf16>, vector<8x8xbf16>, vector<8x8xbf16> -> vector<8x32xbf16>
    %c0_43 = arith.constant 0 : index
    %c0_44 = arith.constant 0 : index
    %c0_45 = arith.constant 0 : index
    %93 = vector.load %arg5[%c0_43, %c0_44, %c0_45] : memref<1x8x32xbf16, #tpu.memory_space<vmem>>, vector<1x8x32xbf16>
    %94 = vector.shape_cast %93 : vector<1x8x32xbf16> to vector<8x32xbf16>
    %95 = vector.shape_cast %92 : vector<8x32xbf16> to vector<1x8x32xbf16>
    tpu.vector_store %arg5[%c0_43, %c0_44, %c0_45], %95 {strides = array<i32>} : memref<1x8x32xbf16, #tpu.memory_space<vmem>>, vector<1x8x32xbf16>,
    return
  }
  func.func @transform_0(%arg0: i32, %arg1: i32) -> (i32, i32, i32) {
    %c0_i32 = arith.constant 0 : i32
    %c0_i32_0 = arith.constant 0 : i32
    return %arg0, %arg1, %c0_i32 : i32, i32, i32
  }
  func.func @transform_1(%arg0: i32, %arg1: i32) -> (i32, i32, i32) {
    %c0_i32 = arith.constant 0 : i32
    %c0_i32_0 = arith.constant 0 : i32
    %c0_i32_1 = arith.constant 0 : i32
    return %arg0, %c0_i32, %c0_i32_0 : i32, i32, i32
  }
  func.func @transform_2(%arg0: i32, %arg1: i32) -> (i32, i32, i32, i32) {
    %c0_i32 = arith.constant 0 : i32
    %c0_i32_0 = arith.constant 0 : i32
    %c0_i32_1 = arith.constant 0 : i32
    %c0_i32_2 = arith.constant 0 : i32
    return %arg0, %c0_i32, %c0_i32_0, %c0_i32_1 : i32, i32, i32, i32
  }
  func.func @transform_3(%arg0: i32, %arg1: i32) -> (i32, i32, i32) {
    %c0_i32 = arith.constant 0 : i32
    %c0_i32_0 = arith.constant 0 : i32
    return %arg0, %arg1, %c0_i32 : i32, i32, i32
  }
}

</mosaic_0001>

<bundles_post_ra>
// kernel: standard_bert_self_attention.2
= control target key start
LH: loop header
LB: loop body
LE: loop exit
PB: predicated region body
PF: predicated region fallthrough
CT: control target
= control target key end

     0   :  { %vm19_vm0 = vcmask 785408   ;;  %v151_v0 = vmov 0.0   ;;  %vm152_vm1 = vmmov 0   ;;  %vm47_vm2 = vcmask 261120   ;;  %s195_s1 = inlined_call_operand.vmem [shape: bf16[32,96], index: 1, kind: input, shape index: {}]   ;;  %s196_s0 = inlined_call_operand.vmem [shape: bf16[16,32], index: 0, kind: input, shape index: {}]   ;;  %s197_s2 = inlined_call_operand.vmem [shape: f32[1,96], index: 2, kind: input, shape index: {}]   ;;  %s198_s3 = inlined_call_operand.vmem [shape: bf16[16,96], index: 3, kind: output, shape index: {}]  }
   0x1   :  { %138 = vmatprep.subr.bf16.mxu0 %v151_v0  ;;  %v148_v1 = vld [vmem:[%s195_s1] sm:$0xff]   ;;  %142 = vmatprep.mubr.msk.bf16.mxu0 %vm152_vm1, %v151_v0  ;;  %20 = vst.msk [vmem:[#allocation2] sm:$0xff] %vm19_vm0, %v151_v0  ;;  %21 = vst.msk [vmem:[#allocation2 + $0x8] sm:$0xff] %vm19_vm0, %v151_v0  ;;  %v149_v2 = vld [vmem:[%s195_s1 + $0x8] sm:$0xff]   ;;  %vm119_vm3 = vcmask 781312  }
   0x2   :  { %139 = vmatpush3.bf16.msra.mxu0 %v148_v1  ;;  %v150_v3 = vld [vmem:[%s196_s0] sm:$0xff]  }
   0x3   :  { %140 = vmatprep.subr.bf16.mxu0 %v151_v0  ;;  %v130_v12 = vld [vmem:[%s197_s2] ss:$0 sm:$0xff] }
   0x6   :  { %141 = vmatpush3.bf16.msra.mxu0 %v149_v2 }
   0x8   :  { %v22_v4 = vld [vmem:[#allocation2] sm:$0xff]  ;;  %v23_v6 = vld [vmem:[#allocation2 + $0x8] sm:$0xff] }
   0x9   :  { %143 = vmatmul.mubr.msk.bf16.vlgmr.msra.gmra.mrb[0].mxu0 %vm47_vm2, %v150_v3 }
  0xdc   :  { %v85_v5 = vpop.f32.mrb[0].mxu0 }
  0xdd   :  { %v92_v7 = vadd.f32 %v85_v5, %v22_v4  ;;  %v144_v8 = vpop.f32.mrb[1].mxu0 }
  0xde   :  { %v88_v9 = vpop.f32.mrb[2].mxu0 }
  0xdf   :  { %95 = vst.msk [vmem:[#allocation2] sm:$0xff] %vm19_vm0, %v92_v7  ;;  %v93_v10 = vadd.f32 %v88_v9, %v23_v6  ;;  %v145_v11 = vpop.f32.mrb[3].mxu0 }
  0xe1   :  { %96 = vst.msk [vmem:[#allocation2 + $0x8] sm:$0xff] %vm19_vm0, %v93_v10 }
  0xe6   :  { %v100_v13 = vld [vmem:[#allocation2] sm:$0xff] }
  0xe7   :  { %v109_v14 = vadd.f32 %v130_v12, %v100_v13 }
  0xe8   :  { %v101_v15 = vld [vmem:[#allocation2 + $0x8] sm:$0xff] }
  0xe9   :  { %v133_v16 = vpack.c.bf16 %v109_v14, %v109_v14  ;;  %v110_v17 = vadd.f32 %v130_v12, %v101_v15 }
  0xeb   :  { %120 = vst.msk [vmem:[%s198_s3] sm:$0xf] %vm119_vm3, %v133_v16  ;;  %v134_v18 = vpack.c.bf16 %v110_v17, %v110_v17 }
  0xed   :  { %121 = vst.msk [vmem:[%s198_s3 + $0x4] sm:$0xf] %vm119_vm3, %v134_v18 }

// kernel: standard_bert_self_attention.3
= control target key start
LH: loop header
LB: loop body
LE: loop exit
PB: predicated region body
PF: predicated region fallthrough
CT: control target
= control target key end

     0   :  { %8 = vsyncpa [#allocation3], 0  ;;  %s1305_s0 = inlined_call_operand.vmem [shape: bf16[2,8,96], index: 0, kind: input, shape index: {}, may-alias: {0,1}]   ;;  %s1306_s1 = inlined_call_operand.vmem [shape: bf16[2,8,96], index: 1, kind: input, shape index: {}, may-alias: {0,1}]   ;;  %s1307_s2 = inlined_call_operand.vmem [shape: f32[2,1,1,8], index: 2, kind: input, shape index: {}]   ;;  %s1308_s3 = inlined_call_operand.hbm [shape: bf16[2,8,32], index: 3, kind: output, shape index: {}]  }
   0x1   :  { %10 = vsyncpa [#allocation3 + $0x1], 0  ;;  %s1111_s12 = smov 0   ;;  %s1113_s13 = smov 0  }
   0x2   :  { %s1115_s14 = smov 0   ;;  %s1117_s15 = smov 0  }
   0x3   :  { %s1119_s16 = smov 0   ;;  %s1121_s17 = smov 0  }
   0x4 LB: > { %s818_s18 = sadd.s32 4294967295, %s1072_s17   ;;  %s819_s19 = sadd.s32 4294967294, %s1072_s17   ;;  %s1072_s17 = sphi %s1121_s17, %s16_s17   ;;  %s1068_s16 = sphi %s1119_s16, %s1315_s16   ;;  %s1064_s15 = sphi %s1117_s15, %s1314_s15   ;;  %s1060_s14 = sphi %s1115_s14, %s1313_s14   ;;  %s1056_s13 = sphi %s1113_s13, %s1312_s13   ;;  %s1052_s12 = sphi %s1111_s12, %s1311_s12  }
   0x5   : > { %s28_s20 = sadd.s32 1, %s1068_s16  ;;  %s117_s21 = sadd.s32 1, %s1060_s14 }
   0x6   : > { %p30_p0 = scmp.ge.s32.totalorder %s28_s20, 2  ;;  %p127_p1 = scmp.ne.s32.totalorder %s1060_s14, %s1056_s13 }
   0x7   : > { %p128_p2 = scmp.eq.s32.totalorder %s818_s18, 1  ;;  %p133_p3 = scmp.ne.s32.totalorder %s1056_s13, %s1052_s12 }
   0x8   : > { %s1317_s20 = smov (%p30_p0, %s28_s20), 0  ;;  %p134_p5 = scmp.eq.s32.totalorder %s819_s19, 1 }
   0x9   : > { %p1151_p4 = por %p128_p2, %p127_p1  ;;  %s112_s23 = ssub.s32 %s1068_s16, %s1317_s20 }
   0xa   : > { %p822_p6 = scmp.ge.s32.totalorder %s1072_s17, 1  ;;  %p115_p7 = scmp.eq.s32.totalorder %s112_s23, 0 }
   0xb   : > { %p1158_p8 = por %p134_p5, %p133_p3  ;;  %p175_p9 = scmp.lt.s32.totalorder %s1072_s17, 3 }
   0xc   : > { %s1164_s25 = scalar_select %p115_p7, %s1060_s14, %s117_s21  }
   0xd   : > { %p176_p10 = pnand %p822_p6, %p175_p9 }
   0xe   : > { %p208_p11 = scmp.lt.s32.totalorder (!%p176_p10), %s1064_s15, 1  ;;  %v1074_v0 = vmov (!%p176_p10), 0.0   ;;  %vm1075_vm0 = vmmov (!%p176_p10), 0   ;;  %s1076_s4 = smov (!%p176_p10), 96   ;;  %vm237_vm1 = vcmask (!%p176_p10), 64512   ;;  %vm301_vm2 = vcmask (!%p176_p10), 1043456  }
   0xf   : > { %179 = sbr.rel (%p176_p10) target bundleno = 1315 (0x523), region = 32  ;;  %857 = vmatprep.subr.bf16.mxu0 (!%p176_p10), %v1074_v0  ;;  %859 = vmatprep.mubr.msk.bf16.mxu0 (!%p176_p10), %vm1075_vm0, %v1074_v0  ;;  %s1077_s8 = smov (!%p176_p10), 64   ;;  %vm702_vm3 = vcmask (!%p176_p10), 130048   ;;  %vm705_vm4 = vcmask (!%p176_p10), 195584   ;;  %vm709_vm5 = vcmask (!%p176_p10), 257024  }
  0x10   : > { %863 = vmatprep.subr.bf16.mxu1 (!%p176_p10), %v1074_v0  ;;  %865 = vmatprep.mubr.msk.bf16.mxu1 (!%p176_p10), %vm1075_vm0, %v1074_v0  ;;  %s1078_s9 = smov (!%p176_p10), 88   ;;  %s1079_s10 = smov (!%p176_p10), 120  }
  0x11   : > { %s1080_s11 = smov (!%p176_p10), 80   ;;  %s1081_s18 = smov (!%p176_p10), 112  }
  0x12   : > { %s1082_s19 = smov (!%p176_p10), 72   ;;  %s1083_s21 = smov (!%p176_p10), 104  }
  0x13   : > { %s1085_s29 = smov (!%p176_p10), 56   ;;  %s1088_s5 = smov (!%p176_p10), 16  }
  0x14   : > { %s1089_s6 = smov (!%p176_p10), 24  }
  0x16   : > { %s1171_s26 = scalar_select %p208_p11, %s1064_s15, 1 }
  0x18   : > { %s824_s27 = sshll.u32 %s1171_s26, 2  ;;  %s221_s28 = scalar_lea.vmem %s1307_s2, %s1171_s26 }
  0x19   : > { %s218_s30 = scalar_lea.vmem %s1306_s1, %s824_s27  ;;  %s214_s7 = scalar_lea.vmem %s1305_s0, %s824_s27  ;;  %v1199_v6 = vld [vmem:[%s221_s28] ss:$0 sm:$0xff] }
  0x1a   : > { %v1180_v1 = vld [vmem:[%s218_s30] ss:$0 sps:$4 sm:$0xff]   ;;  %s1084_s26 = smov 48   ;;  %s1086_s30 = smov 40  }
  0x1b   : > { %235 = vrot.lane.b32.xlu0 %v1180_v1, %s1076_s4  ;;  %v230_v4 = vld [vmem:[%s214_s7] sm:$0xf]  ;;  %296 = vrot.lane.b32.xlu1 %v1180_v1, %s1077_s8  ;;  %s1087_s4 = smov 8   ;;  %s205_s7 = sand.u32 1, %s1056_s13  }
  0x1c   : > { %v830_v5 = vcombine.low %v230_v4, %v230_v4  ;;  %s823_s8 = sshll.u32 %s205_s7, 2  ;;  %s1090_s27 = smov [#allocation2]  }
  0x1d   : > { %s998_s28 = sshll.u32 %s1090_s27, 4  ;;  %s999_s28 = int_to_ptr.vmem [resolvable:$false] %s998_s28 }
  0x1f   : > { %353 = vrot.lane.b32.xlu1 %v1180_v1, %s1078_s9  ;;  %s838_s9 = sshll.u32 %s1064_s15, 6  ;;  %s712_s15 = scalar_lea.sflag [#allocation3], %s205_s7 }
  0x23   : > { %351 = vrot.lane.b32.xlu1 %v830_v5, %s1079_s10  ;;  %s207_s10 = scalar_lea.vmem [#allocation2], %s823_s8 }
  0x27   : > { %466 = vrot.lane.b32.xlu1 %v1180_v1, %s1080_s11  ;;  %s726_s11 = sshll.u32 %s207_s10, 4  ;;  %s1260_s11 = int_to_ptr.vmem [resolvable:$true] %s726_s11 }
  0x28   : > { %s994_s23 = scalar_lea.vmem %s1260_s11, 64  ;;  %p1001_p1 = scmp.lt.s32.totalorder %s1260_s11, %s999_s28 }
  0x29   : > { %p995_p12 = scmp.ne.s32.totalorder %s1260_s11, %s994_s23 }
  0x2b   : > { %464 = vrot.lane.b32.xlu1 %v830_v5, %s1081_s18  ;;  %p996_p13 = pnand %p995_p12, %p1151_p4 }
  0x2d   : > { %p997_p0 = pneg %p996_p13 }
  0x2f   : > { %579 = vrot.lane.b32.xlu1 %v1180_v1, %s1082_s19 }
  0x33   : > { %577 = vrot.lane.b32.xlu1 %v830_v5, %s1083_s21  ;;  %s1258_s21 = scalar_lea.hbm %s1308_s3, %s838_s9 }
  0x8d   : > { %v236_v2 = vpop.permute.xlu0 %235  ;;  %v297_v13 = vpop.permute.xlu1 %296 }
  0x8e   : > { %v242_v3 = vsel %vm237_vm1, %v236_v2, 0  ;;  %v303_v14 = vsel %vm301_vm2, %v297_v13, 0 }
  0x8f   : > { %858 = vmatpush3.bf16.xpose.msra.mxu0 %v242_v3  ;;  %864 = vmatpush3.bf16.msra.mxu1 %v303_v14 }
  0x90   : > { %875 = vmatprep.subr.bf16.mxu0 %v1074_v0  ;;  %869 = vmatprep.subr.bf16.mxu1 %v1074_v0 }
  0x91   : > { %v354_v19 = vpop.permute.xlu1 %353 }
  0x92   : > { %v359_v21 = vsel %vm237_vm1, %v354_v19, 0 }
  0x95   : > { %v352_v20 = vpop.permute.xlu1 %351 }
  0x96   : > { %860 = vmatmul.mubr.msk.bf16.vlgmr.msra.gmra.mrb[0].mxu0 %vm237_vm1, %v230_v4 }
  0x97   : > { %877 = vmatprep.mubr.msk.bf16.mxu0 %vm1075_vm0, %v1074_v0 }
  0x99   : > { %v467_v23 = vpop.permute.xlu1 %466 }
  0x9a   : > { %v472_v24 = vsel %vm237_vm1, %v467_v23, 0 }
  0x9d   : > { %v465_v25 = vpop.permute.xlu1 %464 }
  0xa1   : > { %v580_v26 = vpop.permute.xlu1 %579 }
  0xa2   : > { %v585_v27 = vsel %vm237_vm1, %v580_v26, 0 }
  0xa5   : > { %v578_v28 = vpop.permute.xlu1 %577 }
 0x169   : > { %v278_v7 = vpop.f32.mrb[0].mxu0 }
 0x16a   : > { %v279_v8 = vadd.f32 %v1199_v6, %v278_v7  ;;  %v861_v9 = vpop.f32.mrb[1].mxu0 }
 0x16b   : > { %v281_v10 = vpop.f32.mrb[2].mxu0 }
 0x16c   : > { %v862_v11 = vpop.f32.mrb[3].mxu0  ;;  %v284_v12 = vsel %vm237_vm1, %v279_v8, -inf }
 0x16d   : > { %285 = vmax.xlane.f32.xlu0 %v284_v12 }
 0x1fa   : > { %v286_v15 = vpop.xlane.xlu0 %285 }
 0x1fb   : > { %v287_v16 = vsub.f32 %v279_v8, %v286_v15 }
 0x1fd   : > { %v288_v17 = vpack.c.bf16 %v287_v16, %v287_v16 }
 0x1ff   : > { %v290_v18 = vmul.bf16 1069105081, %v288_v17 }
 0x201   : > { %978 = vpow.bf16 %v290_v18 }
 0x20c   : > { %v1206_v22 = vpop.eup %978 }
 0x20d   : > { %866 = vmatmul.mubr.msk.bf16.vlgmr.msra.gmra.mrb[0].mxu1 %vm237_vm1, %v1206_v22 }
 0x20e   : > { %870 = vmatpush3.bf16.xpose.msra.mxu1 %v359_v21  ;;  %871 = vmatprep.mubr.msk.bf16.mxu1 %vm1075_vm0, %v1074_v0 }
 0x20f   : > { %881 = vmatprep.subr.bf16.mxu1 %v1074_v0 }
 0x215   : > { %872 = vmatmul.mubr.msk.bf16.vlgmr.msra.gmra.mrb[4].mxu1 %vm237_vm1, %v352_v20 }
 0x216   : > { %882 = vmatpush3.bf16.xpose.msra.mxu1 %v472_v24  ;;  %883 = vmatprep.mubr.msk.bf16.mxu1 %vm1075_vm0, %v1074_v0 }
 0x217   : > { %893 = vmatprep.subr.bf16.mxu1 %v1074_v0 }
 0x21d   : > { %884 = vmatmul.mubr.msk.bf16.vlgmr.msra.gmra.mrb[8].mxu1 %vm237_vm1, %v465_v25 }
 0x21e   : > { %894 = vmatpush3.bf16.xpose.msra.mxu1 %v585_v27  ;;  %895 = vmatprep.mubr.msk.bf16.mxu1 %vm1075_vm0, %v1074_v0 }
 0x225   : > { %896 = vmatmul.mubr.msk.bf16.vlgmr.msra.gmra.mrb[12].mxu1 %vm237_vm1, %v578_v28 }
 0x2e0   : > { %v1223_v29 = vpop.f32.mrb[0].mxu1 }
 0x2e1   : > { %v867_v30 = vpop.f32.mrb[1].mxu1 }
 0x2e2   : > { %v342_v31 = vpop.f32.mrb[2].mxu1 }
 0x2e3   : > { %v868_v32 = vpop.f32.mrb[3].mxu1 }
 0x2e8   : > { %v395_v33 = vpop.f32.mrb[4].mxu1 }
 0x2e9   : > { %v396_v34 = vadd.f32 %v1199_v6, %v395_v33  ;;  %v873_v35 = vpop.f32.mrb[5].mxu1 }
 0x2ea   : > { %v398_v36 = vpop.f32.mrb[6].mxu1 }
 0x2eb   : > { %v874_v37 = vpop.f32.mrb[7].mxu1  ;;  %v401_v38 = vsel %vm237_vm1, %v396_v34, -inf }
 0x2ec   : > { %402 = vmax.xlane.f32.xlu1 %v401_v38 }
 0x2f0   : > { %v508_v39 = vpop.f32.mrb[8].mxu1 }
 0x2f1   : > { %v509_v40 = vadd.f32 %v1199_v6, %v508_v39  ;;  %v885_v41 = vpop.f32.mrb[9].mxu1 }
 0x2f2   : > { %v511_v42 = vpop.f32.mrb[10].mxu1 }
 0x2f3   : > { %v886_v43 = vpop.f32.mrb[11].mxu1  ;;  %v514_v44 = vsel %vm237_vm1, %v509_v40, -inf }
 0x2f4   : > { %515 = vmax.xlane.f32.xlu0 %v514_v44 }
 0x2f8   : > { %v621_v45 = vpop.f32.mrb[12].mxu1 }
 0x2f9   : > { %v897_v46 = vpop.f32.mrb[13].mxu1  ;;  %v622_v49 = vadd.f32 %v1199_v6, %v621_v45 }
 0x2fa   : > { %v624_v47 = vpop.f32.mrb[14].mxu1 }
 0x2fb   : > { %v898_v48 = vpop.f32.mrb[15].mxu1  ;;  %v627_v50 = vsel %vm237_vm1, %v622_v49, -inf }
 0x2fd   : > { %526 = vrot.lane.b32.xlu1 %v1180_v1, %s1084_s26  ;;  %s1000_s26 = scalar_lea.vmem %s999_s28, 128 }
 0x2fe   : > { %p1002_p2 = scmp.lt.s32.totalorder %s1000_s26, %s994_s23 }
 0x300   : > { %p1003_p3 = por %p1002_p2, %p1001_p1 }
 0x302   : > { %p1004_p5 = pnand %p1003_p3, %p997_p0 }
 0x30a   : > { %413 = vrot.lane.b32.xlu0 %v1180_v1, %s1085_s29 }
 0x329   : > { %628 = vmax.xlane.f32.xlu0 %v627_v50 }
 0x33f   : > { %639 = vrot.lane.b32.xlu0 %v1180_v1, %s1086_s30 }
 0x379   : > { %v403_v51 = vpop.xlane.xlu1 %402 }
 0x37a   : > { %v404_v52 = vsub.f32 %v396_v34, %v403_v51 }
 0x37c   : > { %v405_v53 = vpack.c.bf16 %v404_v52, %v404_v52 }
 0x37d   : > { %v527_v61 = vpop.permute.xlu1 %526 }
 0x37e   : > { %v407_v54 = vmul.bf16 1069105081, %v405_v53  ;;  %v532_v62 = vsel %vm301_vm2, %v527_v61, 0 }
 0x380   : > { %980 = vpow.bf16 %v407_v54 }
 0x381   : > { %v516_v55 = vpop.xlane.xlu0 %515 }
 0x382   : > { %v517_v56 = vsub.f32 %v509_v40, %v516_v55 }
 0x384   : > { %v518_v57 = vpack.c.bf16 %v517_v56, %v517_v56 }
 0x385   : > { %v414_v58 = vpop.permute.xlu0 %413 }
 0x386   : > { %v520_v59 = vmul.bf16 1069105081, %v518_v57  ;;  %v419_v60 = vsel %vm301_vm2, %v414_v58, 0 }
 0x387   : > { %876 = vmatpush3.bf16.msra.mxu0 %v419_v60 }
 0x388   : > { %982 = vpow.bf16 %v520_v59  ;;  %887 = vmatprep.subr.bf16.mxu0 %v1074_v0 }
 0x38b   : > { %v981_v63 = vpop.eup %980 }
 0x38c   : > { %878 = vmatmul.mubr.msk.bf16.vlgmr.msra.gmra.mrb[4].mxu0 %vm237_vm1, %v981_v63  ;;  %v409_v1 = vunpack.c.l.bf16 %v981_v63 }
 0x38d   : > { %888 = vmatpush3.bf16.msra.mxu0 %v532_v62  ;;  %889 = vmatprep.mubr.msk.bf16.mxu0 %vm1075_vm0, %v1074_v0 }
 0x38e   : > { %v410_v2 = vsel %vm237_vm1, %v409_v1, 0.0  ;;  %899 = vmatprep.subr.bf16.mxu0 %v1074_v0 }
 0x38f   : > { %411 = vadd.xlane.f32.xlu0 %v410_v2 }
 0x393   : > { %v983_v3 = vpop.eup %982 }
 0x394   : > { %890 = vmatmul.mubr.msk.bf16.vlgmr.msra.gmra.mrb[8].mxu0 %vm237_vm1, %v983_v3  ;;  %v522_v4 = vunpack.c.l.bf16 %v983_v3 }
 0x395   : > { %901 = vmatprep.mubr.msk.bf16.mxu0 %vm1075_vm0, %v1074_v0  ;;  %v292_v0 = vunpack.c.l.bf16 %v1206_v22 }
 0x396   : > { %v523_v5 = vsel %vm237_vm1, %v522_v4, 0.0 }
 0x397   : > { %524 = vadd.xlane.f32.xlu1 %v523_v5  ;;  %v293_v15 = vsel %vm237_vm1, %v292_v0, 0.0 }
 0x3b6   : > { %v629_v6 = vpop.xlane.xlu0 %628 }
 0x3b7   : > { %v630_v7 = vsub.f32 %v622_v49, %v629_v6 }
 0x3b9   : > { %v631_v8 = vpack.c.bf16 %v630_v7, %v630_v7 }
 0x3ba   : > { %v640_v9 = vpop.permute.xlu0 %639 }
 0x3bb   : > { %v633_v10 = vmul.bf16 1069105081, %v631_v8  ;;  %v645_v11 = vsel %vm301_vm2, %v640_v9, 0 }
 0x3bc   : > { %900 = vmatpush3.bf16.msra.mxu0 %v645_v11 }
 0x3bd   : > { %984 = vpow.bf16 %v633_v10 }
 0x3c8   : > { %v985_v12 = vpop.eup %984 }
 0x3c9   : > { %902 = vmatmul.mubr.msk.bf16.vlgmr.msra.gmra.mrb[12].mxu0 %vm237_vm1, %v985_v12  ;;  %v635_v13 = vunpack.c.l.bf16 %v985_v12 }
 0x3cb   : > { %v636_v14 = vsel %vm237_vm1, %v635_v13, 0.0 }
 0x3cc   : > { %637 = vadd.xlane.f32.xlu0 %v636_v14 }
 0x3d0   : > { %294 = vadd.xlane.f32.xlu0 %v293_v15 }
 0x41c   : > { %v412_v16 = vpop.xlane.xlu0 %411 }
 0x41d   : > { %986 = vrcp.f32 %v412_v16 }
 0x424   : > { %v525_v17 = vpop.xlane.xlu1 %524 }
 0x425   : > { %988 = vrcp.f32 %v525_v17 }
 0x427   : > { %v987_v18 = vpop.eup %986 }
 0x42f   : > { %v989_v26 = vpop.eup %988 }
 0x459   : > { %v638_v33 = vpop.xlane.xlu0 %637 }
 0x45a   : > { %990 = vrcp.f32 %v638_v33 }
 0x45d   : > { %v295_v41 = vpop.xlane.xlu0 %294 }
 0x45e   : > { %992 = vrcp.f32 %v295_v41 }
 0x45f   : > { %v455_v19 = vpop.f32.mrb[4].mxu0 }
 0x460   : > { %v462_v20 = vmul.f32 %v987_v18, %v455_v19  ;;  %v879_v21 = vpop.f32.mrb[5].mxu0 }
 0x461   : > { %v458_v23 = vpop.f32.mrb[6].mxu0 }
 0x462   : > { %v463_v24 = vpack.c.bf16 %v462_v20, %v462_v20  ;;  %v880_v25 = vpop.f32.mrb[7].mxu0 }
 0x464   : > { %691 = vrot.lane.b32.xlu0 %v463_v24, %s1087_s4  ;;  %v991_v34 = vpop.eup %990 }
 0x467   : > { %v568_v27 = vpop.f32.mrb[8].mxu0 }
 0x468   : > { %v575_v22 = vmul.f32 %v989_v26, %v568_v27  ;;  %v891_v28 = vpop.f32.mrb[9].mxu0  ;;  %v993_v42 = vpop.eup %992 }
 0x469   : > { %v571_v30 = vpop.f32.mrb[10].mxu0  ;;  %v346_v43 = vmul.f32 %v993_v42, %v1223_v29 }
 0x46a   : > { %v576_v31 = vpack.c.bf16 %v575_v22, %v575_v22  ;;  %v892_v32 = vpop.f32.mrb[11].mxu0 }
 0x46b   : > { %v347_v45 = vpack.c.bf16 %v346_v43, %v346_v43 }
 0x46c   : > { %694 = vrot.lane.b32.xlu1 %v576_v31, %s1088_s5 }
 0x49c   : > { %v681_v35 = vpop.f32.mrb[12].mxu0 }
 0x49d   : > { %v688_v36 = vmul.f32 %v991_v34, %v681_v35  ;;  %v903_v37 = vpop.f32.mrb[13].mxu0 }
 0x49e   : > { %v684_v38 = vpop.f32.mrb[14].mxu0 }
 0x49f   : > { %v689_v39 = vpack.c.bf16 %v688_v36, %v688_v36  ;;  %v904_v40 = vpop.f32.mrb[15].mxu0 }
 0x4a1   : > { %697 = vrot.lane.b32.xlu0 %v689_v39, %s1089_s6 }
 0x4d6   : > { %v692_v44 = vpop.permute.xlu0 %691 }
 0x4d7   : > { %v701_v47 = vsel %vm237_vm1, %v347_v45, %v692_v44 }
 0x4de   : > { %v695_v46 = vpop.permute.xlu1 %694 }
 0x4df   : > { %v704_v48 = vsel %vm702_vm3, %v701_v47, %v695_v46 }
 0x513   : > { %v698_v49 = vpop.permute.xlu0 %697 }
 0x514   : > { %v707_v29 = vsel %vm705_vm4, %v704_v48, %v698_v49 }
 0x515   : > { %710 = vst.msk [vmem:[%s207_s10] sm:$0xf] %vm709_vm5, %v707_v29 }
 0x516   : > { %1007 = shalt.err (!%p1004_p5)
}
 0x517   : > { %s1008_s29 = scalar_lea.hbm %s1258_s21, 64  ;;  %s1012_s5 = scalar_lea.hbm %s1308_s3, 128 }
 0x518   : > { %p1009_p6 = scmp.ne.s32.totalorder %s1258_s21, %s1008_s29  ;;  %p1013_p10 = scmp.lt.u32.totalorder %s1258_s21, %s1308_s3 }
 0x519   : > { %p1014_p11 = scmp.lt.u32.totalorder %s1012_s5, %s1008_s29  ;;  %p1016_p13 = scmp.lt.u32.totalorder %s1008_s29, %s1258_s21 }
 0x51a   : > { %p1010_p7 = pnand %p1009_p6, %p1151_p4 }
 0x51b   : > { %p1015_p12 = por %p1014_p11, %p1013_p10 }
 0x51c   : > { %p1011_p9 = pneg %p1010_p7 }
 0x51d   : > { %p1017_p0 = por %p1016_p13, %p1015_p12 }
 0x51f   : > { %p1018_p1 = pnand %p1017_p0, %p1011_p9 }
 0x521   : > { %1021 = shalt.err (!%p1018_p1)
}
 0x522   : > { %905 = dma.vmem_to_hbm [thread:$0]  (%p1151_p4), %s1260_s11, 64, %s1258_s21, %s712_s15  }
 0x523 PF: > { %p911_p2 = scmp.ge.s32.totalorder %s1072_s17, 2  ;;  %s738_s8 = sand.u32 1, %s1052_s12  }
 0x524   : > { %s739_s9 = scalar_lea.sflag [#allocation3], %s738_s8 }
 0x525   : > { %p908_p3 = pnand %p911_p2, %p1158_p8 }
 0x527   : > { %1047 = dma.done.wait (!%p908_p3), %s739_s9, 64  }
 0x528   : > { %1049 = vsyncadd (!%p908_p3), %s739_s9, 4294967232  ;;  %s16_s17 = sadd.s32 1, %s1072_s17   ;;  %s1311_s12 = smov %s1056_s13 }
 0x529   : > { %p13_p5 = scmp.ge.s32.totalorder %s16_s17, 4   ;;  %s1312_s13 = smov %s1060_s14 }
 0x52a   : > { %s1313_s14 = smov %s1164_s25  ;;  %s1314_s15 = smov %s1068_s16 }
 0x52b   : > { %s1315_s16 = smov %s1317_s20  ;;  %15 = sbr.rel (!%p13_p5) target bundleno = 4 (0x4), region = 73 }
 0x532   :  { %744 = vsyncpa [#allocation3], 1 }
 0x533   :  { %746 = vsyncpa [#allocation3 + $0x1], 1 }

</bundles_post_ra>
